<compile_context>
chip_gen: v7x
topology: tpu7x:2x2x1
jax: 0.10.0
libtpu: 0.0.40
codegen_flags: <defaults>
</compile_context>

<pallas_src>
import jax
import jax.numpy as jnp
from jax.experimental import pallas as pl
from jax.experimental.pallas import tpu as pltpu

# Logical dims (from the PyTorch module).
IN_DIM, H1, H2, NUM_ACTIONS = 8, 150, 120, 4
# Lane-padded hidden widths (internal to the kernel only).
H1_P, H2_P = 256, 128


def dqn_kernel(x_ref, w1_ref, b1_ref, w2_ref, b2_ref, w3_ref, b3_ref, o_ref):
    # layer1 + relu : (T, 8) @ (8, 256)
    h1 = jnp.dot(x_ref[...], w1_ref[...], preferred_element_type=jnp.float32)
    h1 = jnp.maximum(h1 + b1_ref[...], 0.0)
    # layer2 + relu : (T, 256) @ (256, 128)
    h2 = jnp.dot(h1, w2_ref[...], preferred_element_type=jnp.float32)
    h2 = jnp.maximum(h2 + b2_ref[...], 0.0)
    # output_layer (no activation) : (T, 128) @ (128, 4)
    out = jnp.dot(h2, w3_ref[...], preferred_element_type=jnp.float32)
    o_ref[...] = (out + b3_ref[...]).astype(o_ref.dtype)


def _pad2(a, shape):
    """Zero-pad a 2-D array up to `shape`."""
    return jnp.pad(a, ((0, shape[0] - a.shape[0]), (0, shape[1] - a.shape[1])))


def pad_params(params):
    """Pad weights/biases to kernel shapes ONCE (outside any step loop)."""
    w1, b1, w2, b2, w3, b3 = params
    return (
        _pad2(w1, (IN_DIM, H1_P)), _pad2(b1, (1, H1_P)),     # (8, 256), (1, 256)
        _pad2(w2, (H1_P, H2_P)),   _pad2(b2, (1, H2_P)),     # (256, 128), (1, 128)
        _pad2(w3, (H2_P, NUM_ACTIONS)), b3,                  # (128, 4),  (1, 4)
    )


def dqn_forward(x, padded_params, *, batch_tile=512):
    """x: (B, 8) f32; padded_params: output of pad_params()."""
    w1p, b1p, w2p, b2p, w3p, b3p = padded_params
    B, in_dim = x.shape
    assert in_dim == IN_DIM

    # Adaptive tile: don't blow an 8-row inference up to 512 rows.
    if B < batch_tile:
        batch_tile = max(8, -(-B // 8) * 8)
    n_tiles = pl.cdiv(B, batch_tile)
    # TODO(synk): on v7x, rounding n_tiles up to an even count would balance the
    # two TensorCores; skipped to avoid extra work on single-TC v5e/v6e.
    Bp = n_tiles * batch_tile
    xp = x if Bp == B else jnp.pad(x, ((0, Bp - B), (0, 0)))

    # Weights/biases: one full-extent block with a constant index_map -> stays
    # VMEM-resident across grid steps; only x (B,8) and out (B,4) stream.
    resident = lambda a: pl.BlockSpec(a.shape, lambda i: (0,) * a.ndim)

    out = pl.pallas_call(
        dqn_kernel,
        out_shape=jax.ShapeDtypeStruct((Bp, NUM_ACTIONS), jnp.float32),
        grid=(n_tiles,),
        in_specs=[
            pl.BlockSpec((batch_tile, IN_DIM), lambda i: (i, 0)),  # x at 8 lanes
            resident(w1p), resident(b1p),
            resident(w2p), resident(b2p),
            resident(w3p), resident(b3p),
        ],
        out_specs=pl.BlockSpec((batch_tile, NUM_ACTIONS), lambda i: (i, 0)),
        compiler_params=pltpu.CompilerParams(
            dimension_semantics=("parallel",),  # shard batch over v7x's 2 TCs
        ),
    )(xp, w1p, b1p, w2p, b2p, w3p, b3p)

    # Only row padding (if any) needs to be removed; lanes are already 4 wide.
    return out if Bp == B else out[:B]


def init_params(key):
    """Deterministic init matching PyTorch nn.Linear default:
    U(-1/sqrt(fan_in), 1/sqrt(fan_in)) for both weight and bias."""
    dims = [(IN_DIM, H1), (H1, H2), (H2, NUM_ACTIONS)]
    params = []
    for (fan_in, fan_out) in dims:
        key, kw, kb = jax.random.split(key, 3)
        bound = 1.0 / jnp.sqrt(fan_in)
        w = jax.random.uniform(kw, (fan_in, fan_out), jnp.float32, -bound, bound)
        b = jax.random.uniform(kb, (1, fan_out), jnp.float32, -bound, bound)
        params.extend([w, b])
    return tuple(params)


def _reference(x, params):
    w1, b1, w2, b2, w3, b3 = params
    h1 = jnp.maximum(x @ w1 + b1, 0.0)
    h2 = jnp.maximum(h1 @ w2 + b2, 0.0)
    return h2 @ w3 + b3


if __name__ == "__main__":
    key = jax.random.PRNGKey(0)
    key, kx1, kx2 = jax.random.split(key, 3)
    params = init_params(key)
    pparams = pad_params(params)   # padded ONCE, reused for every forward call

    # Small-batch / single-state inference path (adaptive small tile).
    batch = 8
    x = jax.random.normal(kx1, (batch, IN_DIM), dtype=jnp.float32)
    out = jax.block_until_ready(dqn_forward(x, pparams))
    ref = _reference(x, params)
    assert out.shape == (batch, NUM_ACTIONS)
    assert jnp.allclose(out, ref, atol=1e-5, rtol=1e-5)

    # Larger, non-tile-aligned batch exercising the batch grid + row padding.
    batch2 = 515
    x2 = jax.random.normal(kx2, (batch2, IN_DIM), dtype=jnp.float32)
    out2 = jax.block_until_ready(dqn_forward(x2, pparams))
    ref2 = _reference(x2, params)
    assert out2.shape == (batch2, NUM_ACTIONS)
    assert jnp.allclose(out2, ref2, atol=1e-5, rtol=1e-5)

    print("KERNEL_OK")
</pallas_src>

<mosaic_0001>
module attributes {stable_mosaic.version = 11 : i64} {
  func.func @dqn_kernel(%arg0: i32, %arg1: memref<8x8xf32, #tpu.memory_space<vmem>>, %arg2: memref<8x256xf32, #tpu.memory_space<vmem>>, %arg3: memref<1x256xf32, #tpu.memory_space<vmem>>, %arg4: memref<256x128xf32, #tpu.memory_space<vmem>>, %arg5: memref<1x128xf32, #tpu.memory_space<vmem>>, %arg6: memref<128x4xf32, #tpu.memory_space<vmem>>, %arg7: memref<1x4xf32, #tpu.memory_space<vmem>>, %arg8: memref<8x4xf32, #tpu.memory_space<vmem>>) attributes {dimension_semantics = [#tpu.dimension_semantics<parallel>], iteration_bounds = array<i64: 1>, scalar_prefetch = 0 : i64, scratch_operands = 0 : i64, tpu.core_type = #tpu.core_type<tc>, window_params = [{transform_indices = @transform_0, window_bounds = array<i64: 8, 8>}, {pipeline_mode = #tpu.pipeline_mode<synchronous>, transform_indices = @transform_1, window_bounds = array<i64: 8, 256>}, {pipeline_mode = #tpu.pipeline_mode<synchronous>, transform_indices = @transform_2, window_bounds = array<i64: 1, 256>}, {pipeline_mode = #tpu.pipeline_mode<synchronous>, transform_indices = @transform_3, window_bounds = array<i64: 256, 128>}, {pipeline_mode = #tpu.pipeline_mode<synchronous>, transform_indices = @transform_4, window_bounds = array<i64: 1, 128>}, {pipeline_mode = #tpu.pipeline_mode<synchronous>, transform_indices = @transform_5, window_bounds = array<i64: 128, 4>}, {pipeline_mode = #tpu.pipeline_mode<synchronous>, transform_indices = @transform_6, window_bounds = array<i64: 1, 4>}, {transform_indices = @transform_7, window_bounds = array<i64: 8, 4>}]} {
    %c0 = arith.constant 0 : index
    %c0_0 = arith.constant 0 : index
    %0 = vector.load %arg1[%c0, %c0_0] : memref<8x8xf32, #tpu.memory_space<vmem>>, vector<8x8xf32>
    %c0_1 = arith.constant 0 : index
    %c0_2 = arith.constant 0 : index
    %1 = vector.load %arg2[%c0_1, %c0_2] : memref<8x256xf32, #tpu.memory_space<vmem>>, vector<8x256xf32>
    %cst = arith.constant dense<0.000000e+00> : vector<8x256xf32>
    %2 = tpu.matmul %0, %1, %cst {dimension_numbers = #tpu.dot_dimension_numbers<[1], [0], [0], [1], [0, 0, 1, 1], [], []>} : vector<8x8xf32>, vector<8x256xf32>, vector<8x256xf32> -> vector<8x256xf32>
    %c0_3 = arith.constant 0 : index
    %c0_4 = arith.constant 0 : index
    %3 = vector.load %arg3[%c0_3, %c0_4] : memref<1x256xf32, #tpu.memory_space<vmem>>, vector<1x256xf32>
    %4 = vector.broadcast %3 : vector<1x256xf32> to vector<8x256xf32>
    %5 = arith.addf %2, %4 : vector<8x256xf32>
    %cst_5 = arith.constant 0.000000e+00 : f32
    %6 = vector.broadcast %cst_5 : f32 to vector<8x256xf32>
    %7 = arith.maximumf %5, %6 : vector<8x256xf32>
    %c0_6 = arith.constant 0 : index
    %c0_7 = arith.constant 0 : index
    %8 = vector.load %arg4[%c0_6, %c0_7] : memref<256x128xf32, #tpu.memory_space<vmem>>, vector<256x128xf32>
    %cst_8 = arith.constant dense<0.000000e+00> : vector<8x128xf32>
    %9 = tpu.matmul %7, %8, %cst_8 {dimension_numbers = #tpu.dot_dimension_numbers<[1], [0], [0], [1], [0, 0, 1, 1], [], []>} : vector<8x256xf32>, vector<256x128xf32>, vector<8x128xf32> -> vector<8x128xf32>
    %c0_9 = arith.constant 0 : index
    %c0_10 = arith.constant 0 : index
    %10 = vector.load %arg5[%c0_9, %c0_10] : memref<1x128xf32, #tpu.memory_space<vmem>>, vector<1x128xf32>
    %11 = vector.broadcast %10 : vector<1x128xf32> to vector<8x128xf32>
    %12 = arith.addf %9, %11 : vector<8x128xf32>
    %cst_11 = arith.constant 0.000000e+00 : f32
    %13 = vector.broadcast %cst_11 : f32 to vector<8x128xf32>
    %14 = arith.maximumf %12, %13 : vector<8x128xf32>
    %c0_12 = arith.constant 0 : index
    %c0_13 = arith.constant 0 : index
    %15 = vector.load %arg6[%c0_12, %c0_13] : memref<128x4xf32, #tpu.memory_space<vmem>>, vector<128x4xf32>
    %cst_14 = arith.constant dense<0.000000e+00> : vector<8x4xf32>
    %16 = tpu.matmul %14, %15, %cst_14 {dimension_numbers = #tpu.dot_dimension_numbers<[1], [0], [0], [1], [0, 0, 1, 1], [], []>} : vector<8x128xf32>, vector<128x4xf32>, vector<8x4xf32> -> vector<8x4xf32>
    %c0_15 = arith.constant 0 : index
    %c0_16 = arith.constant 0 : index
    %17 = vector.load %arg7[%c0_15, %c0_16] : memref<1x4xf32, #tpu.memory_space<vmem>>, vector<1x4xf32>
    %18 = vector.broadcast %17 : vector<1x4xf32> to vector<8x4xf32>
    %19 = arith.addf %16, %18 : vector<8x4xf32>
    %c0_17 = arith.constant 0 : index
    %c0_18 = arith.constant 0 : index
    %20 = vector.load %arg8[%c0_17, %c0_18] : memref<8x4xf32, #tpu.memory_space<vmem>>, vector<8x4xf32>
    tpu.vector_store %arg8[%c0_17, %c0_18], %19 {strides = array<i32>} : memref<8x4xf32, #tpu.memory_space<vmem>>, vector<8x4xf32>,
    return
  }
  func.func @transform_0(%arg0: i32) -> (i32, i32) {
    %c0_i32 = arith.constant 0 : i32
    %c0_i32_0 = arith.constant 0 : i32
    return %arg0, %c0_i32 : i32, i32
  }
  func.func @transform_1(%arg0: i32) -> (i32, i32) {
    %c0_i32 = arith.constant 0 : i32
    %c0_i32_0 = arith.constant 0 : i32
    %c0_i32_1 = arith.constant 0 : i32
    return %c0_i32, %c0_i32_0 : i32, i32
  }
  func.func @transform_2(%arg0: i32) -> (i32, i32) {
    %c0_i32 = arith.constant 0 : i32
    %c0_i32_0 = arith.constant 0 : i32
    %c0_i32_1 = arith.constant 0 : i32
    return %c0_i32, %c0_i32_0 : i32, i32
  }
  func.func @transform_3(%arg0: i32) -> (i32, i32) {
    %c0_i32 = arith.constant 0 : i32
    %c0_i32_0 = arith.constant 0 : i32
    %c0_i32_1 = arith.constant 0 : i32
    return %c0_i32, %c0_i32_0 : i32, i32
  }
  func.func @transform_4(%arg0: i32) -> (i32, i32) {
    %c0_i32 = arith.constant 0 : i32
    %c0_i32_0 = arith.constant 0 : i32
    %c0_i32_1 = arith.constant 0 : i32
    return %c0_i32, %c0_i32_0 : i32, i32
  }
  func.func @transform_5(%arg0: i32) -> (i32, i32) {
    %c0_i32 = arith.constant 0 : i32
    %c0_i32_0 = arith.constant 0 : i32
    %c0_i32_1 = arith.constant 0 : i32
    return %c0_i32, %c0_i32_0 : i32, i32
  }
  func.func @transform_6(%arg0: i32) -> (i32, i32) {
    %c0_i32 = arith.constant 0 : i32
    %c0_i32_0 = arith.constant 0 : i32
    %c0_i32_1 = arith.constant 0 : i32
    return %c0_i32, %c0_i32_0 : i32, i32
  }
  func.func @transform_7(%arg0: i32) -> (i32, i32) {
    %c0_i32 = arith.constant 0 : i32
    %c0_i32_0 = arith.constant 0 : i32
    return %arg0, %c0_i32 : i32, i32
  }
}

</mosaic_0001>

<bundles_post_ra>
// kernel: tpu_custom_call.1
= control target key start
LH: loop header
LB: loop body
LE: loop exit
PB: predicated region body
PF: predicated region fallthrough
CT: control target
= control target key end

     0   :  { %12 = vsyncpa [#allocation3], 0  ;;  %s518_s24 = smov [#allocation2]   ;;  %s647_s0 = inlined_call_operand.vmem [shape: f32[8,8], index: 0, kind: input, shape index: {}]   ;;  %s648_s1 = inlined_call_operand.vmem [shape: f32[8,256], index: 1, kind: input, shape index: {}]   ;;  %s649_s2 = inlined_call_operand.vmem [shape: f32[1,256], index: 2, kind: input, shape index: {}]   ;;  %s650_s3 = inlined_call_operand.hbm [shape: f32[256,128], index: 3, kind: input, shape index: {}]   ;;  %s651_s4 = inlined_call_operand.vmem [shape: f32[1,128], index: 4, kind: input, shape index: {}]   ;;  %s652_s5 = inlined_call_operand.vmem [shape: f32[128,4], index: 5, kind: input, shape index: {}]   ;;  %s653_s6 = inlined_call_operand.vmem [shape: f32[1,4], index: 6, kind: input, shape index: {}]   ;;  %s654_s7 = inlined_call_operand.vmem [shape: f32[8,4], index: 7, kind: output, shape index: {}]  }
   0x1   :  { %s24_s25 = sshll.u32 %s518_s24, 4  ;;  %s494_s28 = scalar_lea.hbm %s650_s3, 4096  ;;  %s25_s25 = int_to_ptr.vmem [resolvable:$true] %s24_s25 }
   0x2   :  { %p495_p0 = scmp.ne.s32.totalorder %s650_s3, %s494_s28  ;;  %p498_p1 = scmp.lt.u32.totalorder %s494_s28, %s650_s3 }
   0x4   :  { %p500_p2 = pnand %p498_p1, %p495_p0 }
   0x6   :  { %503 = shalt.err (!%p500_p2)
}
   0x7   :  { %s504_s10 = scalar_lea.vmem %s25_s25, 4096  ;;  %p509_p4 = scmp.lt.s32.totalorder %s25_s25, %s25_s25 }
   0x8   :  { %p505_p3 = scmp.ne.s32.totalorder %s25_s25, %s504_s10  ;;  %p510_p5 = scmp.lt.s32.totalorder %s504_s10, %s504_s10 }
   0xa   :  { %p511_p6 = por %p510_p5, %p509_p4 }
   0xc   :  { %p512_p7 = pnand %p511_p6, %p505_p3 }
   0xe   :  { %515 = shalt.err (!%p512_p7)
}
   0xf   :  { %s519_s11 = smov 128   ;;  %s520_s12 = smov 8  }
  0x10   :  { %30 = dma.hbm_to_vmem [thread:$0]  %s650_s3, 4096, %s25_s25, [#allocation3], %s519_s11, %s519_s11, %s520_s12  }
  0x11   :  { %516 = dma.done.wait [#allocation3], 4096  }
  0x12   :  { %517 = vsyncadd [#allocation3], 4294963200  ;;  %v521_v0 = vmov 0.0   ;;  %v42_v1 = vld [vmem:[%s648_s1 + $0x8] sm:$0xff]  ;;  %v41_v2 = vld [vmem:[%s648_s1] sm:$0xff]  ;;  %vm55_vm0 = vcmask 64512  }
  0x13   :  { %123 = vmatprep.mubr.f32.mxu0 %v521_v0  ;;  %v40_v3 = vld [vmem:[%s647_s0] sm:$0xff]  ;;  %59 = vmatprep.subr.mxu0 %v42_v1  ;;  %v149_v5 = vld [vmem:[#allocation2 + $0x88] sm:$0xff]  ;;  %v150_v9 = vld [vmem:[#allocation2 + $0x90] sm:$0xff]  ;;  %v522_v55 = vmov 0.0|0.0   ;;  %vm523_vm1 = vmmov 0   ;;  %vm335_vm2 = vcmask 31744  }
  0x14   :  { %v148_v4 = vld [vmem:[#allocation2 + $0x80] sm:$0xff]  ;;  %60 = vmatpush1.msra.mxu0 %v41_v2  ;;  %v133_v8 = vld [vmem:[#allocation2 + $0x8] sm:$0xff]  ;;  %v151_v10 = vld [vmem:[#allocation2 + $0x98] sm:$0xff] }
  0x15   :  { %v132_v6 = vld [vmem:[#allocation2] sm:$0xff]  ;;  %v432_v7 = vpack.c.bf16 %v149_v5, %v148_v4  ;;  %342 = vmatmul.mubr.msk.f32.vlgmr.msra.gmra.mrb[0].mxu0 %vm55_vm0, %v40_v3  ;;  %v436_v12 = vpack.c.bf16 %v151_v10, %v150_v9  ;;  %v134_v13 = vld [vmem:[#allocation2 + $0x10] sm:$0xff]  ;;  %v135_v14 = vld [vmem:[#allocation2 + $0x18] sm:$0xff]  ;;  %464 = vmatprep.subr.bf16.mxu0 %v522_v55 }
  0x16   :  { %v434_v11 = vpack.c.bf16 %v133_v8, %v132_v6  ;;  %v152_v15 = vld [vmem:[#allocation2 + $0xa0] sm:$0xff]  ;;  %v153_v16 = vld [vmem:[#allocation2 + $0xa8] sm:$0xff]  ;;  %v438_v17 = vpack.c.bf16 %v135_v14, %v134_v13  ;;  %v154_v21 = vld [vmem:[#allocation2 + $0xb0] sm:$0xff]  ;;  %v45_v8 = vlaneseq  ;;  %429 = vmatprep.mubr.msk.f32.mxu0 %vm523_vm1, %v521_v0 }
  0x17   :  { %433 = vmatprep.subr.bf16.mxu1 %v432_v7  ;;  %v440_v18 = vpack.c.bf16 %v153_v16, %v152_v15  ;;  %v136_v19 = vld [vmem:[#allocation2 + $0x20] sm:$0xff]  ;;  %v137_v20 = vld [vmem:[#allocation2 + $0x28] sm:$0xff]  ;;  %v155_v22 = vld [vmem:[#allocation2 + $0xb8] sm:$0xff] }
  0x18   :  { %435 = vmatpush3.bf16.msra.mxu1 %v434_v11  ;;  %v442_v23 = vpack.c.bf16 %v137_v20, %v136_v19  ;;  %v444_v24 = vpack.c.bf16 %v155_v22, %v154_v21  ;;  %v138_v25 = vld [vmem:[#allocation2 + $0x30] sm:$0xff]  ;;  %v139_v26 = vld [vmem:[#allocation2 + $0x38] sm:$0xff]  ;;  %v156_v27 = vld [vmem:[#allocation2 + $0xc0] sm:$0xff]  ;;  %v46_v9 = vshrl.u32 %v45_v8, 7 }
  0x19   :  { %437 = vmatprep.subr.bf16.mxu1 %v436_v12  ;;  %v157_v28 = vld [vmem:[#allocation2 + $0xc8] sm:$0xff]  ;;  %v446_v29 = vpack.c.bf16 %v139_v26, %v138_v25  ;;  %v140_v31 = vld [vmem:[#allocation2 + $0x40] sm:$0xff]  ;;  %v158_v33 = vld [vmem:[#allocation2 + $0xd0] sm:$0xff] }
  0x1a   :  { %v448_v30 = vpack.c.bf16 %v157_v28, %v156_v27  ;;  %v141_v32 = vld [vmem:[#allocation2 + $0x48] sm:$0xff]  ;;  %v159_v34 = vld [vmem:[#allocation2 + $0xd8] sm:$0xff]  ;;  %v142_v37 = vld [vmem:[#allocation2 + $0x50] sm:$0xff]  ;;  %v47_v10 = vsub.s32 0, %v46_v9  ;;  %v51_v12 = vsub.s32 1, %v46_v9 }
  0x1b   :  { %v450_v35 = vpack.c.bf16 %v141_v32, %v140_v31  ;;  %v452_v36 = vpack.c.bf16 %v159_v34, %v158_v33  ;;  %v143_v38 = vld [vmem:[#allocation2 + $0x58] sm:$0xff]  ;;  %v160_v39 = vld [vmem:[#allocation2 + $0xe0] sm:$0xff]  ;;  %v161_v40 = vld [vmem:[#allocation2 + $0xe8] sm:$0xff] }
  0x1c   :  { %439 = vmatpush3.bf16.msra.mxu1 %v438_v17  ;;  %v454_v41 = vpack.c.bf16 %v143_v38, %v142_v37  ;;  %v456_v42 = vpack.c.bf16 %v161_v40, %v160_v39  ;;  %v144_v43 = vld [vmem:[#allocation2 + $0x60] sm:$0xff]  ;;  %v145_v44 = vld [vmem:[#allocation2 + $0x68] sm:$0xff]  ;;  %v162_v46 = vld [vmem:[#allocation2 + $0xf0] sm:$0xff] }
  0x1d   :  { %441 = vmatprep.subr.bf16.mxu1 %v440_v18  ;;  %v458_v45 = vpack.c.bf16 %v145_v44, %v144_v43  ;;  %v163_v47 = vld [vmem:[#allocation2 + $0xf8] sm:$0xff]  ;;  %v146_v49 = vld [vmem:[#allocation2 + $0x70] sm:$0xff]  ;;  %v242_v52 = vld [vmem:[%s652_s5] sm:$0xff] }
  0x1e   :  { %v460_v48 = vpack.c.bf16 %v163_v47, %v162_v46  ;;  %v147_v50 = vld [vmem:[#allocation2 + $0x78] sm:$0xff]  ;;  %v243_v53 = vld [vmem:[%s652_s5 + $0x8] sm:$0xff]  ;;  %v244_v54 = vld [vmem:[%s652_s5 + $0x10] sm:$0xff] }
  0x1f   :  { %v462_v51 = vpack.c.bf16 %v147_v50, %v146_v49  ;;  %v465_v56 = vpack.c.bf16 %v243_v53, %v242_v52  ;;  %v245_v57 = vld [vmem:[%s652_s5 + $0x18] sm:$0xff]  ;;  %v246_v59 = vld [vmem:[%s652_s5 + $0x20] sm:$0xff]  ;;  %v247_v60 = vld [vmem:[%s652_s5 + $0x28] sm:$0xff] }
  0x20   :  { %443 = vmatpush3.bf16.msra.mxu1 %v442_v23  ;;  %v468_v58 = vpack.c.bf16 %v245_v57, %v244_v54  ;;  %v471_v61 = vpack.c.bf16 %v247_v60, %v246_v59  ;;  %v248_v62 = vld [vmem:[%s652_s5 + $0x30] sm:$0xff]  ;;  %v249_v63 = vld [vmem:[%s652_s5 + $0x38] sm:$0xff]  ;;  %v250_v2 = vld [vmem:[%s652_s5 + $0x40] sm:$0xff] }
  0x21   :  { %445 = vmatprep.subr.bf16.mxu1 %v444_v24  ;;  %466 = vmatpush3.bf16.msra.mxu0 %v465_v56  ;;  %v474_v1 = vpack.c.bf16 %v249_v63, %v248_v62  ;;  %v251_v3 = vld [vmem:[%s652_s5 + $0x48] sm:$0xff]  ;;  %v252_v5 = vld [vmem:[%s652_s5 + $0x50] sm:$0xff]  ;;  %v253_v6 = vld [vmem:[%s652_s5 + $0x58] sm:$0xff] }
  0x22   :  { %467 = vmatprep.subr.bf16.mxu0 %v522_v55  ;;  %v477_v4 = vpack.c.bf16 %v251_v3, %v250_v2  ;;  %v480_v7 = vpack.c.bf16 %v253_v6, %v252_v5  ;;  %v43_v11 = vld [vmem:[%s649_s2] sm:$0x3]  ;;  %v255_v22 = vld [vmem:[%s652_s5 + $0x68] sm:$0xff]  ;;  %v256_v24 = vld [vmem:[%s652_s5 + $0x70] sm:$0xff] }
  0x23   :  { %v48_v13 = vrot.slane %v43_v11, %v47_v10  ;;  %v52_v14 = vrot.slane %v43_v11, %v51_v12  ;;  %v254_v21 = vld [vmem:[%s652_s5 + $0x60] sm:$0xff]  ;;  %v257_v25 = vld [vmem:[%s652_s5 + $0x78] sm:$0xff] }
  0x24   :  { %447 = vmatpush3.bf16.msra.mxu1 %v446_v29  ;;  %v483_v23 = vpack.c.bf16 %v255_v22, %v254_v21  ;;  %v486_v26 = vpack.c.bf16 %v257_v25, %v256_v24  ;;  %v343_v28 = vld [vmem:[%s651_s4] ss:$0 sm:$0xff] }
  0x25   :  { %449 = vmatprep.subr.bf16.mxu1 %v448_v30  ;;  %469 = vmatpush3.bf16.msra.mxu0 %v468_v58  ;;  %v344_v33 = vld [vmem:[%s653_s6] ss:$0 sm:$0xff] }
  0x26   :  { %470 = vmatprep.subr.bf16.mxu0 %v522_v55 }
  0x28   :  { %451 = vmatpush3.bf16.msra.mxu1 %v450_v35 }
  0x29   :  { %453 = vmatprep.subr.bf16.mxu1 %v452_v36  ;;  %472 = vmatpush3.bf16.msra.mxu0 %v471_v61 }
  0x2a   :  { %473 = vmatprep.subr.bf16.mxu0 %v522_v55 }
  0x2c   :  { %455 = vmatpush3.bf16.msra.mxu1 %v454_v41 }
  0x2d   :  { %457 = vmatprep.subr.bf16.mxu1 %v456_v42  ;;  %475 = vmatpush3.bf16.msra.mxu0 %v474_v1 }
  0x2e   :  { %476 = vmatprep.subr.bf16.mxu0 %v522_v55 }
  0x30   :  { %459 = vmatpush3.bf16.msra.mxu1 %v458_v45 }
  0x31   :  { %461 = vmatprep.subr.bf16.mxu1 %v460_v48  ;;  %478 = vmatpush3.bf16.msra.mxu0 %v477_v4 }
  0x32   :  { %479 = vmatprep.subr.bf16.mxu0 %v522_v55 }
  0x34   :  { %463 = vmatpush3.bf16.msra.mxu1 %v462_v51 }
  0x35   :  { %481 = vmatpush3.bf16.msra.mxu0 %v480_v7 }
  0x36   :  { %482 = vmatprep.subr.bf16.mxu0 %v522_v55 }
  0x39   :  { %484 = vmatpush3.bf16.msra.mxu0 %v483_v23 }
  0x3a   :  { %485 = vmatprep.subr.bf16.mxu0 %v522_v55 }
  0x3d   :  { %487 = vmatpush3.bf16.msra.mxu0 %v486_v26 }
  0xe8   :  { %v125_v15 = vpop.f32.mrb[0].mxu0 }
  0xe9   :  { %v126_v16 = vadd.f32 %v125_v15, %v48_v13  ;;  %v127_v17 = vpop.f32.mrb[1].mxu0 }
  0xea   :  { %v128_v18 = vadd.f32 %v127_v17, %v52_v14 }
  0xeb   :  { %v130_v20 = vmax.f32 %v126_v16, 0.0 }
  0xec   :  { %v131_v19 = vmax.f32 %v128_v18, 0.0 }
  0xee   :  { %235 = vmatprep.mubr.f32.mxu1 %v131_v19 }
  0xef   :  { %236 = vmatmul.mubr.f32.vlgmr.msra.gmra.mrb[0].mxu1 %v130_v20 }
 0x1c2   :  { %v377_v27 = vpop.f32.mrb[0].mxu1 }
 0x1c3   :  { %v378_v29 = vpop.f32.mrb[1].mxu1 }
 0x1c4   :  { %v379_v30 = vadd.f32 %v378_v29, %v377_v27 }
 0x1c6   :  { %v238_v31 = vadd.f32 %v379_v30, %v343_v28 }
 0x1c8   :  { %v241_v32 = vmax.f32 %v238_v31, 0.0 }
 0x1ca   :  { %430 = vmatmul.mubr.f32.vlgmr.msra.gmra.mrb[2].mxu0 %v241_v32 }
 0x29d   :  { %v331_v34 = vpop.f32.mrb[2].mxu0 }
 0x29e   :  { %v332_v35 = vadd.f32 %v344_v33, %v331_v34  ;;  %v431_v36 = vpop.f32.mrb[3].mxu0 }
 0x2a0   :  { %336 = vst.msk [vmem:[%s654_s7] sm:$0xff] %vm335_vm2, %v332_v35 }
 0x2a1   :  { %341 = vsyncpa [#allocation3], 1 }

</bundles_post_ra>
